<compile_context>
chip_gen: v6e
topology: v6e:2x2x1
jax: 0.10.0
libtpu: 0.0.40
codegen_flags: <defaults>
</compile_context>

<pallas_src>
import functools

import jax
import jax.numpy as jnp
from jax import lax
from jax.experimental import pallas as pl
from jax.experimental.pallas import tpu as pltpu


def _rvq_kernel(x_ref, cb_ref, e2_ref, q_out_ref, loss_ref, *,
                num_quantizers, tile_rows, total_rows):
    """One grid step = one row tile; all quantizer stages run in-kernel.

    x_ref:     (TN, D)      f32  input rows for this tile
    cb_ref:    (Q, K, D)    f32  all codebooks (VMEM-resident, same block every step)
    e2_ref:    (Q, 1, K)    f32  precomputed ||codebook||^2 per entry
    q_out_ref: (TN, D)      f32  quantized output for this tile
    loss_ref:  (1, 8, 128)  f32  per-tile un-normalized commitment-loss partial (broadcast)
    """
    tile = pl.program_id(0)

    # Rows past the true N are zero padding; exclude them from the loss.
    row_ids = tile * tile_rows + lax.broadcasted_iota(jnp.int32, (tile_rows, 1), 0)
    valid = (row_ids < total_rows).astype(jnp.float32)            # (TN, 1)

    q_out_ref[...] = jnp.zeros_like(q_out_ref)

    def stage(q, loss_acc):
        # residual after q stages == x - accumulated quantized output
        res = x_ref[...] - q_out_ref[...]                         # (TN, D) f32
        cb = cb_ref[q]                                            # (K, D)  f32

        # distances up to a per-row constant: ||e_k||^2 - 2 <r, e_k>  (bf16 MXU matmul)
        dots = lax.dot_general(
            res.astype(jnp.bfloat16), cb.astype(jnp.bfloat16),
            dimension_numbers=(((1,), (1,)), ((), ())),
            preferred_element_type=jnp.float32)                   # (TN, K)
        dist = e2_ref[q] - 2.0 * dots                             # (TN, K)

        idx = jnp.argmin(dist, axis=-1)                           # (TN,) first-occurrence ties
        onehot = (lax.broadcasted_iota(jnp.int32, dist.shape, 1)
                  == idx[:, None]).astype(jnp.float32)            # (TN, K)
        quant = jnp.dot(onehot, cb,
                        preferred_element_type=jnp.float32)       # (TN, D) exact f32 gather

        diff = (quant - res) * valid
        loss_acc = loss_acc + jnp.sum(diff * diff)

        q_out_ref[...] = q_out_ref[...] + quant
        return loss_acc

    loss_sum = lax.fori_loop(0, num_quantizers, stage, jnp.float32(0.0))
    loss_ref[...] = jnp.broadcast_to(loss_sum, loss_ref.shape)


@jax.jit
def residual_vector_quantize(x_ncd, codebooks):
    """x_ncd: (B, D, T) float32, codebooks: (Q, K, D) float32.

    Returns (quantized (B, D, T), commit_loss scalar).
    """
    b, d, t = x_ncd.shape
    q_num, k_size, d_cb = codebooks.shape
    assert d_cb == d, "codebook_dim must equal input_dim (no projection path)"

    # (B, D, T) -> (B, T, D) -> (N, D) row slab, lane axis = channel dim
    n = b * t
    x_rows = jnp.transpose(x_ncd, (0, 2, 1)).reshape(n, d).astype(jnp.float32)

    # Row tile: 256 targets a full MXU pass on v6e/v7x, fine on v5e; bounded VMEM on v7x.
    tn = min(256, ((n + 7) // 8) * 8)
    n_tiles = -(-n // tn)
    n_pad = n_tiles * tn
    if n_pad != n:
        x_rows = jnp.pad(x_rows, ((0, n_pad - n), (0, 0)))

    cb_f32 = codebooks.astype(jnp.float32)
    e2 = jnp.sum(cb_f32 * cb_f32, axis=-1)[:, None, :]            # (Q, 1, K), hoisted

    kernel = functools.partial(
        _rvq_kernel,
        num_quantizers=q_num,
        tile_rows=tn,
        total_rows=n,
    )

    grid_spec = pltpu.PrefetchScalarGridSpec(
        num_scalar_prefetch=0,
        grid=(n_tiles,),
        in_specs=[
            pl.BlockSpec((tn, d), lambda i: (i, 0)),              # x row tile
            pl.BlockSpec((q_num, k_size, d), lambda i: (0, 0, 0)),  # all codebooks, resident
            pl.BlockSpec((q_num, 1, k_size), lambda i: (0, 0, 0)),  # ||e||^2, resident
        ],
        out_specs=[
            pl.BlockSpec((tn, d), lambda i: (i, 0)),              # quantized row tile
            pl.BlockSpec((1, 8, 128), lambda i: (i, 0, 0)),       # per-tile loss partial
        ],
    )

    quantized_rows, loss_tiles = pl.pallas_call(
        kernel,
        grid_spec=grid_spec,
        out_shape=(
            jax.ShapeDtypeStruct((n_pad, d), jnp.float32),
            jax.ShapeDtypeStruct((n_tiles, 8, 128), jnp.float32),
        ),
        compiler_params=pltpu.CompilerParams(
            dimension_semantics=("parallel",),   # tiles are independent (megacore on v7x)
            vmem_limit_bytes=32 * 1024 * 1024,
        ),
    )(x_rows, cb_f32, e2)

    # (N, D) -> (B, T, D) -> (B, D, T)
    quantized = jnp.transpose(quantized_rows[:n].reshape(b, t, d), (0, 2, 1))
    # sum over quantizers of mean((quant - res)^2) over the true N*D elements
    commit_loss = jnp.sum(loss_tiles[:, 0, 0]) / jnp.float32(n * d)
    return quantized, commit_loss


if __name__ == "__main__":
    # Small shapes consistent with the module (input_dim == codebook_dim == 128).
    B, D, T = 2, 128, 16
    NUM_QUANTIZERS = 4
    CODEBOOK_SIZE = 256

    key = jax.random.PRNGKey(0)
    kx, kcb = jax.random.split(key)
    x = jax.random.normal(kx, (B, D, T), dtype=jnp.float32)
    codebooks = jax.random.normal(
        kcb, (NUM_QUANTIZERS, CODEBOOK_SIZE, D), dtype=jnp.float32)

    quantized, commit_loss = residual_vector_quantize(x, codebooks)
    jax.block_until_ready((quantized, commit_loss))

    assert quantized.shape == (B, D, T)
    assert commit_loss.shape == ()
    assert bool(jnp.isfinite(commit_loss))
    print("KERNEL_OK")
</pallas_src>

<mosaic_0001>
module attributes {stable_mosaic.version = 11 : i64} {
  func.func @_rvq_kernel(%arg0: i32, %arg1: memref<32x128xf32, #tpu.memory_space<vmem>>, %arg2: memref<4x256x128xf32, #tpu.memory_space<vmem>>, %arg3: memref<4x1x256xf32, #tpu.memory_space<vmem>>, %arg4: memref<32x128xf32, #tpu.memory_space<vmem>>, %arg5: memref<1x8x128xf32, #tpu.memory_space<vmem>>) attributes {dimension_semantics = [#tpu.dimension_semantics<parallel>], iteration_bounds = array<i64: 1>, scalar_prefetch = 0 : i64, scratch_operands = 0 : i64, tpu.core_type = #tpu.core_type<tc>, window_params = [{transform_indices = @transform_0, window_bounds = array<i64: 32, 128>}, {pipeline_mode = #tpu.pipeline_mode<synchronous>, transform_indices = @transform_1, window_bounds = array<i64: 4, 256, 128>}, {pipeline_mode = #tpu.pipeline_mode<synchronous>, transform_indices = @transform_2, window_bounds = array<i64: 4, 1, 256>}, {transform_indices = @transform_3, window_bounds = array<i64: 32, 128>}, {transform_indices = @transform_4, window_bounds = array<i64: 1, 8, 128>}]} {
    %c32_i32 = arith.constant 32 : i32
    %0 = arith.muli %arg0, %c32_i32 : i32
    %1 = tpu.iota {dimensions = array<i32: 0>} : vector<32x1xi32>
    %2 = vector.broadcast %0 : i32 to vector<32x1xi32>
    %3 = arith.addi %2, %1 : vector<32x1xi32>
    %c32_i32_0 = arith.constant 32 : i32
    %4 = vector.broadcast %c32_i32_0 : i32 to vector<32x1xi32>
    %5 = arith.cmpi slt, %3, %4 : vector<32x1xi32>
    %6 = arith.extui %5 : vector<32x1xi1> to vector<32x1xi32>
    %7 = arith.sitofp %6 : vector<32x1xi32> to vector<32x1xf32>
    %cst = arith.constant 0.000000e+00 : f32
    %8 = vector.broadcast %cst : f32 to vector<32x128xf32>
    %c0 = arith.constant 0 : index
    %c0_1 = arith.constant 0 : index
    %9 = vector.load %arg4[%c0, %c0_1] : memref<32x128xf32, #tpu.memory_space<vmem>>, vector<32x128xf32>
    tpu.vector_store %arg4[%c0, %c0_1], %8 {strides = array<i32>} : memref<32x128xf32, #tpu.memory_space<vmem>>, vector<32x128xf32>,
    %cst_2 = arith.constant 0.000000e+00 : f32
    %c0_i32 = arith.constant 0 : i32
    %c4_i32 = arith.constant 4 : i32
    %10 = arith.addi %c0_i32, %c4_i32 : i32
    %c1_i32 = arith.constant 1 : i32
    %11 = scf.for %arg6 = %c0_i32 to %10 step %c1_i32 iter_args(%arg7 = %cst_2) -> (f32)  : i32 {
      %c0_7 = arith.constant 0 : index
      %c0_8 = arith.constant 0 : index
      %14 = vector.load %arg1[%c0_7, %c0_8] : memref<32x128xf32, #tpu.memory_space<vmem>>, vector<32x128xf32>
      %c0_9 = arith.constant 0 : index
      %c0_10 = arith.constant 0 : index
      %15 = vector.load %arg4[%c0_9, %c0_10] : memref<32x128xf32, #tpu.memory_space<vmem>>, vector<32x128xf32>
      %16 = arith.subf %14, %15 : vector<32x128xf32>
      %17 = arith.index_cast %arg6 : i32 to index
      %c0_11 = arith.constant 0 : index
      %c0_12 = arith.constant 0 : index
      %18 = vector.load %arg2[%17, %c0_11, %c0_12] : memref<4x256x128xf32, #tpu.memory_space<vmem>>, vector<1x256x128xf32>
      %19 = vector.shape_cast %18 : vector<1x256x128xf32> to vector<256x128xf32>
      %20 = arith.truncf %16 : vector<32x128xf32> to vector<32x128xbf16>
      %21 = arith.truncf %19 : vector<256x128xf32> to vector<256x128xbf16>
      %cst_13 = arith.constant dense<0.000000e+00> : vector<32x256xf32>
      %22 = tpu.matmul %20, %21, %cst_13 {dimension_numbers = #tpu.dot_dimension_numbers<[1], [1], [0], [0], [0, 0, 1, 0], [], []>} : vector<32x128xbf16>, vector<256x128xbf16>, vector<32x256xf32> -> vector<32x256xf32>
      %23 = arith.index_cast %arg6 : i32 to index
      %c0_14 = arith.constant 0 : index
      %c0_15 = arith.constant 0 : index
      %24 = vector.load %arg3[%23, %c0_14, %c0_15] : memref<4x1x256xf32, #tpu.memory_space<vmem>>, vector<1x1x256xf32>
      %25 = vector.shape_cast %24 : vector<1x1x256xf32> to vector<1x256xf32>
      %cst_16 = arith.constant 2.000000e+00 : f32
      %26 = vector.broadcast %cst_16 : f32 to vector<32x256xf32>
      %27 = arith.mulf %26, %22 : vector<32x256xf32>
      %28 = vector.broadcast %25 : vector<1x256xf32> to vector<32x256xf32>
      %29 = arith.subf %28, %27 : vector<32x256xf32>
      %30 = tpu.reduce_index %29 {axis = 1 : i32, kind = #tpu.reduction_kind<arg_min>} : vector<32x256xf32> -> vector<32xi32>
      %31 = tpu.iota {dimensions = array<i32: 1>} : vector<32x256xi32>
      %32 = vector.shape_cast %30 : vector<32xi32> to vector<32x1xi32>
      %33 = vector.broadcast %32 : vector<32x1xi32> to vector<32x256xi32>
      %34 = arith.cmpi eq, %31, %33 : vector<32x256xi32>
      %35 = arith.extui %34 : vector<32x256xi1> to vector<32x256xi32>
      %36 = arith.sitofp %35 : vector<32x256xi32> to vector<32x256xf32>
      %cst_17 = arith.constant dense<0.000000e+00> : vector<32x128xf32>
      %37 = tpu.matmul %36, %19, %cst_17 {dimension_numbers = #tpu.dot_dimension_numbers<[1], [0], [0], [1], [0, 0, 1, 1], [], []>} : vector<32x256xf32>, vector<256x128xf32>, vector<32x128xf32> -> vector<32x128xf32>
      %38 = arith.subf %37, %16 : vector<32x128xf32>
      %39 = vector.broadcast %7 : vector<32x1xf32> to vector<32x128xf32>
      %40 = arith.mulf %38, %39 : vector<32x128xf32>
      %41 = arith.mulf %40, %40 : vector<32x128xf32>
      %42 = vector.shape_cast %41 : vector<32x128xf32> to vector<1x32x128xf32>
      %cst_18 = arith.constant dense<0.000000e+00> : vector<1xf32>
      %43 = vector.multi_reduction <add>, %42, %cst_18 [1, 2] : vector<1x32x128xf32> to vector<1xf32>
      %44 = vector.shape_cast %43 : vector<1xf32> to vector<1x1x1xf32>
      %45 = vector.extract %44[0, 0, 0] : f32 from vector<1x1x1xf32>
      %46 = arith.addf %arg7, %45 : f32
      %c0_19 = arith.constant 0 : index
      %c0_20 = arith.constant 0 : index
      %47 = vector.load %arg4[%c0_19, %c0_20] : memref<32x128xf32, #tpu.memory_space<vmem>>, vector<32x128xf32>
      %48 = arith.addf %47, %37 : vector<32x128xf32>
      %c0_21 = arith.constant 0 : index
      %c0_22 = arith.constant 0 : index
      %49 = vector.load %arg4[%c0_21, %c0_22] : memref<32x128xf32, #tpu.memory_space<vmem>>, vector<32x128xf32>
      tpu.vector_store %arg4[%c0_21, %c0_22], %48 {strides = array<i32>} : memref<32x128xf32, #tpu.memory_space<vmem>>, vector<32x128xf32>,
      scf.yield %46 : f32
    }
    %c4_i32_3 = arith.constant 4 : i32
    %12 = vector.broadcast %11 : f32 to vector<1x8x128xf32>
    %c0_4 = arith.constant 0 : index
    %c0_5 = arith.constant 0 : index
    %c0_6 = arith.constant 0 : index
    %13 = vector.load %arg5[%c0_4, %c0_5, %c0_6] : memref<1x8x128xf32, #tpu.memory_space<vmem>>, vector<1x8x128xf32>
    tpu.vector_store %arg5[%c0_4, %c0_5, %c0_6], %12 {strides = array<i32>} : memref<1x8x128xf32, #tpu.memory_space<vmem>>, vector<1x8x128xf32>,
    return
  }
  func.func @transform_0(%arg0: i32) -> (i32, i32) {
    %c0_i32 = arith.constant 0 : i32
    %c0_i32_0 = arith.constant 0 : i32
    return %arg0, %c0_i32 : i32, i32
  }
  func.func @transform_1(%arg0: i32) -> (i32, i32, i32) {
    %c0_i32 = arith.constant 0 : i32
    %c0_i32_0 = arith.constant 0 : i32
    %c0_i32_1 = arith.constant 0 : i32
    %c0_i32_2 = arith.constant 0 : i32
    return %c0_i32, %c0_i32_0, %c0_i32_1 : i32, i32, i32
  }
  func.func @transform_2(%arg0: i32) -> (i32, i32, i32) {
    %c0_i32 = arith.constant 0 : i32
    %c0_i32_0 = arith.constant 0 : i32
    %c0_i32_1 = arith.constant 0 : i32
    %c0_i32_2 = arith.constant 0 : i32
    return %c0_i32, %c0_i32_0, %c0_i32_1 : i32, i32, i32
  }
  func.func @transform_3(%arg0: i32) -> (i32, i32) {
    %c0_i32 = arith.constant 0 : i32
    %c0_i32_0 = arith.constant 0 : i32
    return %arg0, %c0_i32 : i32, i32
  }
  func.func @transform_4(%arg0: i32) -> (i32, i32, i32) {
    %c0_i32 = arith.constant 0 : i32
    %c0_i32_0 = arith.constant 0 : i32
    %c0_i32_1 = arith.constant 0 : i32
    return %arg0, %c0_i32, %c0_i32_0 : i32, i32, i32
  }
}

</mosaic_0001>

<bundles_post_ra>
// kernel: residual_vector_quantize.1
= control target key start
LH: loop header
LB: loop body
LE: loop exit
PB: predicated region body
PF: predicated region fallthrough
CT: control target
= control target key end

     0   :  { %10 = vsyncpa [#allocation3], 0  ;;  %s744_s0 = inlined_call_operand.hbm [shape: f32[32,128], index: 0, kind: input, shape index: {}]   ;;  %s745_s1 = inlined_call_operand.vmem [shape: f32[4,256,128], index: 1, kind: input, shape index: {}]   ;;  %s746_s2 = inlined_call_operand.vmem [shape: f32[4,1,256], index: 2, kind: input, shape index: {}]   ;;  %s747_s3 = inlined_call_operand.hbm [shape: f32[32,128], index: 3, kind: output, shape index: {0}]   ;;  %s748_s4 = inlined_call_operand.vmem [shape: f32[1,8,128], index: 4, kind: output, shape index: {1}]  }
   0x1   :  { %11 = vsyncpa [#allocation4], 0  ;;  %s596_s15 = smov [#allocation2]  }
   0x2   :  { %s17_s16 = sshll.u32 %s596_s15, 4  ;;  %s18_s16 = int_to_ptr.vmem [resolvable:$true] %s17_s16 }
   0x3   :  { %s544_s17 = scalar_lea.vmem %s18_s16, 512  ;;  %p549_p1 = scmp.lt.s32.totalorder %s18_s16, %s18_s16 }
   0x4   :  { %p545_p0 = scmp.ne.s32.totalorder %s18_s16, %s544_s17  ;;  %p550_p2 = scmp.lt.s32.totalorder %s544_s17, %s544_s17 }
   0x6   :  { %p551_p3 = por %p550_p2, %p549_p1 }
   0x8   :  { %p552_p4 = pnand %p551_p3, %p545_p0 }
   0xa   :  { %555 = shalt.err (!%p552_p4)
}
   0xb   :  { %s597_s18 = smov 128   ;;  %s598_s19 = smov 8  }
   0xc   :  { %23 = dma.hbm_to_vmem [thread:$0]  %s744_s0, 512, %s18_s16, [#allocation3], %s597_s18, %s597_s18, %s598_s19  }
   0xd   :  { %584 = dma.done.wait [#allocation3], 512  }
   0xe   :  { %585 = vsyncadd [#allocation3], 4294966784  ;;  %v599_v0 = vmov 0.0   ;;  %s633_s22 = smov 0.0   ;;  %s635_s23 = smov 0  }
   0xf   :  { %55 = vst [vmem:[#allocation5] sm:$0xff] %v599_v0  ;;  %56 = vst [vmem:[#allocation5 + $0x8] sm:$0xff] %v599_v0 }
  0x10   :  { %57 = vst [vmem:[#allocation5 + $0x10] sm:$0xff] %v599_v0  ;;  %58 = vst [vmem:[#allocation5 + $0x18] sm:$0xff] %v599_v0 }
  0x11 LB: > { %v66_v1 = vld [vmem:[#allocation2] sm:$0xff]  ;;  %v67_v2 = vld [vmem:[#allocation2 + $0x8] sm:$0xff]  ;;  %s425_s0 = sshll.u32 %s594_s23, 8  ;;  %v68_v56 = vld [vmem:[#allocation2 + $0x10] sm:$0xff]  ;;  %v195_v63 = vlaneseq  ;;  %s426_s27 = sshll.u32 %s594_s23, 1  ;;  %s594_s23 = sphi %s635_s23, %s64_s23   ;;  %s590_s22 = sphi %s633_s22, %s749_s22  }
  0x12   : > { %s657_s26 = scalar_lea.vmem %s745_s1, %s425_s0  ;;  %v69_v57 = vld [vmem:[#allocation2 + $0x18] sm:$0xff]  ;;  %s184_s30 = scalar_lea.vmem %s746_s2, %s426_s27 }
  0x13   : > { %v110_v7 = vld [vmem:[%s657_s26 + $0xf0] sm:$0xff]  ;;  %v111_v8 = vld [vmem:[%s657_s26 + $0xf8] sm:$0xff]  ;;  %v108_v13 = vld [vmem:[%s657_s26 + $0xe0] sm:$0xff]  ;;  %v196_v0 = vshrl.u32 %v195_v63, 7  ;;  %s64_s23 = sadd.s32 1, %s594_s23  }
  0x14   : > { %v94_v9 = vld [vmem:[%s657_s26 + $0x70] sm:$0xff]  ;;  %v129_v11 = vpack.c.bf16 %v111_v8, %v110_v7  ;;  %v95_v12 = vld [vmem:[%s657_s26 + $0x78] sm:$0xff]  ;;  %v109_v14 = vld [vmem:[%s657_s26 + $0xe8] sm:$0xff]  ;;  %463 = vmatprep.subr.mxu1 %v111_v8  ;;  %p61_p5 = scmp.ge.s32.totalorder %s64_s23, 4  }
  0x15   : > { %v121_v15 = vpack.c.bf16 %v95_v12, %v94_v9  ;;  %v128_v16 = vpack.c.bf16 %v109_v14, %v108_v13  ;;  %464 = vmatpush3.msra.mxu1 %v95_v12  ;;  %v92_v17 = vld [vmem:[%s657_s26 + $0x60] sm:$0xff]  ;;  %v93_v18 = vld [vmem:[%s657_s26 + $0x68] sm:$0xff]  ;;  %v106_v19 = vld [vmem:[%s657_s26 + $0xd0] sm:$0xff]  ;;  %s601_s9 = smov (%p61_p5), [#allocation5]  }
  0x16   : > { %v643_v3 = vld [vmem:[#allocation5] sm:$0xff]  ;;  %v645_v4 = vld [vmem:[#allocation5 + $0x8] sm:$0xff]  ;;  %443 = vmatprep.subr.bf16.mxu0 %v129_v11  ;;  %465 = vmatprep.subr.mxu1 %v110_v7  ;;  %v107_v20 = vld [vmem:[%s657_s26 + $0xd8] sm:$0xff]  ;;  %v120_v21 = vpack.c.bf16 %v93_v18, %v92_v17  ;;  %s397_s10 = sshll.u32 (%p61_p5), %s601_s9, 4  ;;  %s398_s10 = int_to_ptr.vmem [resolvable:$true] %s397_s10 }
  0x17   : > { %v648_v5 = vsub.f32 %v66_v1, %v643_v3  ;;  %v652_v6 = vsub.f32 %v67_v2, %v645_v4  ;;  %444 = vmatpush3.bf16.xpose.msra.mxu0 %v121_v15  ;;  %466 = vmatpush3.msra.mxu1 %v94_v9  ;;  %v127_v22 = vpack.c.bf16 %v107_v20, %v106_v19  ;;  %v91_v23 = vld [vmem:[%s657_s26 + $0x58] sm:$0xff]  ;;  %v90_v24 = vld [vmem:[%s657_s26 + $0x50] sm:$0xff]  ;;  %v105_v25 = vld [vmem:[%s657_s26 + $0xc8] sm:$0xff]  ;;  %v197_v1 = vsub.s32 0, %v196_v0  ;;  %s556_s11 = scalar_lea.vmem (%p61_p5), %s398_s10, 512  ;;  %p561_p7 = scmp.lt.s32.totalorder (%p61_p5), %s398_s10, %s398_s10 }
  0x18   : > { %445 = vmatprep.subr.bf16.mxu0 %v128_v16  ;;  %467 = vmatprep.subr.mxu1 %v109_v14  ;;  %v89_v26 = vld [vmem:[%s657_s26 + $0x48] sm:$0xff]  ;;  %v104_v27 = vld [vmem:[%s657_s26 + $0xc0] sm:$0xff]  ;;  %v119_v29 = vpack.c.bf16 %v91_v23, %v90_v24  ;;  %v103_v30 = vld [vmem:[%s657_s26 + $0xb8] sm:$0xff]  ;;  %v201_v2 = vsub.s32 1, %v196_v0  ;;  %p557_p6 = scmp.ne.s32.totalorder (%p61_p5), %s398_s10, %s556_s11  ;;  %p562_p8 = scmp.lt.s32.totalorder (%p61_p5), %s556_s11, %s556_s11 }
  0x19   : > { %v664_v10 = vpack.c.bf16 %v652_v6, %v648_v5  ;;  %468 = vmatpush3.msra.mxu1 %v93_v18  ;;  %v88_v28 = vld [vmem:[%s657_s26 + $0x40] sm:$0xff]  ;;  %v126_v31 = vpack.c.bf16 %v105_v25, %v104_v27  ;;  %v87_v32 = vld [vmem:[%s657_s26 + $0x38] sm:$0xff]  ;;  %v102_v33 = vld [vmem:[%s657_s26 + $0xb0] sm:$0xff] }
  0x1a   : > { %469 = vmatprep.subr.mxu1 %v108_v13  ;;  %v86_v34 = vld [vmem:[%s657_s26 + $0x30] sm:$0xff]  ;;  %v101_v35 = vld [vmem:[%s657_s26 + $0xa8] sm:$0xff]  ;;  %v100_v37 = vld [vmem:[%s657_s26 + $0xa0] sm:$0xff]  ;;  %v118_v39 = vpack.c.bf16 %v89_v26, %v88_v28  ;;  %v125_v41 = vpack.c.bf16 %v103_v30, %v102_v33  ;;  %p563_p9 = por (%p61_p5), %p562_p8, %p561_p7 }
  0x1b   : > { %459 = vmatprep.mubr.bf16.mxu0 %v664_v10  ;;  %470 = vmatpush3.msra.mxu1 %v92_v17  ;;  %v85_v36 = vld [vmem:[%s657_s26 + $0x28] sm:$0xff]  ;;  %v84_v38 = vld [vmem:[%s657_s26 + $0x20] sm:$0xff]  ;;  %v99_v40 = vld [vmem:[%s657_s26 + $0x98] sm:$0xff]  ;;  %v117_v49 = vpack.c.bf16 %v87_v32, %v86_v34  ;;  %v124_v50 = vpack.c.bf16 %v101_v35, %v100_v37 }
  0x1c   : > { %471 = vmatprep.subr.mxu1 %v107_v20  ;;  %v83_v42 = vld [vmem:[%s657_s26 + $0x18] sm:$0xff]  ;;  %v98_v43 = vld [vmem:[%s657_s26 + $0x90] sm:$0xff]  ;;  %v97_v45 = vld [vmem:[%s657_s26 + $0x88] sm:$0xff]  ;;  %v116_v51 = vpack.c.bf16 %v85_v36, %v84_v38  ;;  %p564_p10 = pnand (%p61_p5), %p563_p9, %p557_p6 }
  0x1d   : > { %472 = vmatpush3.msra.mxu1 %v91_v23  ;;  %v82_v44 = vld [vmem:[%s657_s26 + $0x10] sm:$0xff]  ;;  %v81_v46 = vld [vmem:[%s657_s26 + $0x8] sm:$0xff]  ;;  %v96_v47 = vld [vmem:[%s657_s26 + $0x80] sm:$0xff]  ;;  %v123_v52 = vpack.c.bf16 %v99_v40, %v98_v43 }
  0x1e   : > { %473 = vmatprep.subr.mxu1 %v106_v19  ;;  %v80_v48 = vld [vmem:[%s657_s26] sm:$0xff]  ;;  %v115_v53 = vpack.c.bf16 %v83_v42, %v82_v44  ;;  %v122_v54 = vpack.c.bf16 %v97_v45, %v96_v47  ;;  %v696_v58 = vld [vmem:[#allocation5 + $0x10] sm:$0xff]  ;;  %v698_v59 = vld [vmem:[#allocation5 + $0x18] sm:$0xff] }
  0x1f   : > { %446 = vmatpush3.bf16.xpose.msra.mxu0 %v120_v21  ;;  %474 = vmatpush3.msra.mxu1 %v90_v24  ;;  %v114_v55 = vpack.c.bf16 %v81_v46, %v80_v48  ;;  %v701_v60 = vsub.f32 %v68_v56, %v696_v58  ;;  %v704_v61 = vsub.f32 %v69_v57, %v698_v59  ;;  %v185_v7 = vld [vmem:[%s184_s30] sm:$0x3] }
  0x20   : > { %447 = vmatprep.subr.bf16.mxu0 %v127_v22  ;;  %475 = vmatprep.subr.mxu1 %v105_v25  ;;  %v198_v11 = vrot.slane %v185_v7, %v197_v1  ;;  %v202_v12 = vrot.slane %v185_v7, %v201_v2 }
  0x21   : > { %476 = vmatpush3.msra.mxu1 %v89_v26  ;;  %v113_v62 = vpack.c.bf16 %v704_v61, %v701_v60 }
  0x22   : > { %477 = vmatprep.subr.mxu1 %v104_v27 }
  0x23   : > { %478 = vmatpush3.msra.mxu1 %v88_v28 }
  0x24   : > { %479 = vmatprep.subr.mxu1 %v103_v30 }
  0x25   : > { %480 = vmatpush3.msra.mxu1 %v87_v32 }
  0x26   : > { %481 = vmatprep.subr.mxu1 %v102_v33 }
  0x27   : > { %448 = vmatpush3.bf16.xpose.msra.mxu0 %v119_v29  ;;  %482 = vmatpush3.msra.mxu1 %v86_v34 }
  0x28   : > { %449 = vmatprep.subr.bf16.mxu0 %v126_v31  ;;  %483 = vmatprep.subr.mxu1 %v101_v35 }
  0x29   : > { %484 = vmatpush3.msra.mxu1 %v85_v36 }
  0x2a   : > { %485 = vmatprep.subr.mxu1 %v100_v37 }
  0x2b   : > { %486 = vmatpush3.msra.mxu1 %v84_v38  ;;  %v214_v38 = vand.u32 127, %v195_v63 }
  0x2c   : > { %487 = vmatprep.subr.mxu1 %v99_v40 }
  0x2d   : > { %488 = vmatpush3.msra.mxu1 %v83_v42  ;;  %v215_v40 = vadd.s32 128, %v214_v38 }
  0x2e   : > { %489 = vmatprep.subr.mxu1 %v98_v43 }
  0x2f   : > { %450 = vmatpush3.bf16.xpose.msra.mxu0 %v118_v39  ;;  %490 = vmatpush3.msra.mxu1 %v82_v44 }
  0x30   : > { %451 = vmatprep.subr.bf16.mxu0 %v125_v41  ;;  %491 = vmatprep.subr.mxu1 %v97_v45 }
  0x31   : > { %492 = vmatpush3.msra.mxu1 %v81_v46 }
  0x32   : > { %493 = vmatprep.subr.mxu1 %v96_v47 }
  0x33   : > { %494 = vmatpush3.msra.mxu1 %v80_v48 }
  0x37   : > { %452 = vmatpush3.bf16.xpose.msra.mxu0 %v117_v49  ;;  %v600_v49 = vmov 1.0  }
  0x38   : > { %453 = vmatprep.subr.bf16.mxu0 %v124_v50 }
  0x3f   : > { %454 = vmatpush3.bf16.xpose.msra.mxu0 %v116_v51 }
  0x40   : > { %455 = vmatprep.subr.bf16.mxu0 %v123_v52 }
  0x47   : > { %456 = vmatpush3.bf16.xpose.msra.mxu0 %v115_v53 }
  0x48   : > { %457 = vmatprep.subr.bf16.mxu0 %v122_v54 }
  0x4f   : > { %458 = vmatpush3.bf16.xpose.msra.mxu0 %v114_v55 }
  0x56   : > { %460 = vmatmul.mubr.bf16.vlgmr.msra.gmra.mxu0 %v664_v10 }
  0x57   : > { %461 = vmatprep.mubr.bf16.mxu0 %v113_v62 }
  0x5e   : > { %462 = vmatmul.mubr.bf16.gmra.mxu0 %v113_v62 }
 0x116   : > { %v164_v8 = vpop.f32.mrf.mxu0 }
 0x117   : > { %v186_v9 = vmul.f32 2.0, %v164_v8 }
 0x118   : > { %v166_v13 = vpop.f32.mrf.mxu0 }
 0x119   : > { %v187_v14 = vmul.f32 2.0, %v166_v13  ;;  %v205_v10 = vsub.f32 %v198_v11, %v186_v9 }
 0x11a   : > { %v168_v15 = vpop.f32.mrf.mxu0 }
 0x11b   : > { %v206_v16 = vsub.f32 %v202_v12, %v187_v14  ;;  %v188_v17 = vmul.f32 2.0, %v168_v15 }
 0x11c   : > { %v170_v18 = vpop.f32.mrf.mxu0 }
 0x11d   : > { %v189_v19 = vmul.f32 2.0, %v170_v18  ;;  %vm216_vm0 = vcmp.le.f32.partialorder %v205_v10, %v206_v16  ;;  %v207_v22 = vsub.f32 %v198_v11, %v188_v17 }
 0x11e   : > { %v174_v20 = vpop.f32.mrf.mxu0  ;;  %v217_v21 = vsel %vm216_vm0, %v205_v10, %v206_v16  ;;  %v218_v42 = vsel %vm216_vm0, %v214_v38, %v215_v40 }
 0x11f   : > { %v208_v23 = vsub.f32 %v202_v12, %v189_v19  ;;  %v190_v24 = vmul.f32 2.0, %v174_v20  ;;  %219 = vmin.index.xlane.f32.xlu0 %v217_v21 }
 0x120   : > { %v176_v25 = vpop.f32.mrf.mxu0 }
 0x121   : > { %v209_v26 = vsub.f32 %v198_v11, %v190_v24  ;;  %v191_v27 = vmul.f32 2.0, %v176_v25  ;;  %vm224_vm1 = vcmp.le.f32.partialorder %v207_v22, %v208_v23 }
 0x122   : > { %v178_v28 = vpop.f32.mrf.mxu0  ;;  %v225_v29 = vsel %vm224_vm1, %v207_v22, %v208_v23  ;;  %v226_v44 = vsel %vm224_vm1, %v214_v38, %v215_v40 }
 0x123   : > { %v210_v30 = vsub.f32 %v202_v12, %v191_v27  ;;  %v192_v31 = vmul.f32 2.0, %v178_v28  ;;  %227 = vmin.index.xlane.f32.xlu0 %v225_v29 }
 0x124   : > { %v180_v32 = vpop.f32.mrf.mxu0 }
 0x125   : > { %v193_v33 = vmul.f32 2.0, %v180_v32  ;;  %vm232_vm2 = vcmp.le.f32.partialorder %v209_v26, %v210_v30  ;;  %v211_v35 = vsub.f32 %v198_v11, %v192_v31 }
 0x126   : > { %v233_v34 = vsel %vm232_vm2, %v209_v26, %v210_v30  ;;  %v234_v46 = vsel %vm232_vm2, %v214_v38, %v215_v40 }
 0x127   : > { %v212_v36 = vsub.f32 %v202_v12, %v193_v33  ;;  %235 = vmin.index.xlane.f32.xlu1 %v233_v34 }
 0x129   : > { %vm240_vm3 = vcmp.le.f32.partialorder %v211_v35, %v212_v36 }
 0x12a   : > { %v241_v37 = vsel %vm240_vm3, %v211_v35, %v212_v36  ;;  %v242_v47 = vsel %vm240_vm3, %v214_v38, %v215_v40 }
 0x12b   : > { %243 = vmin.index.xlane.f32.xlu1 %v241_v37 }
 0x1a8   : > { %v220_v39 = vpop.xlane.xlu0 %219 }
 0x1a9   : > { %531 = vset.pattern.permute.xlu0 %v220_v39 }
 0x1ac   : > { %v228_v41 = vpop.xlane.xlu0 %227 }
 0x1ad   : > { %222 = vperm.xlu0 %531, %v218_v42   ;;  %532 = vset.pattern.permute.xlu1 %v228_v41 }
 0x1b0   : > { %v236_v43 = vpop.xlane.xlu1 %235 }
 0x1b1   : > { %230 = vperm.xlu1 %532, %v226_v44  }
 0x1b4   : > { %v244_v45 = vpop.xlane.xlu1 %243 }
 0x1b5   : > { %533 = vset.pattern.permute.xlu1 %v236_v43  ;;  %535 = vset.pattern.permute.xlu0 %v244_v45 }
 0x1b9   : > { %238 = vperm.xlu1 %533, %v234_v46  }
 0x1bd   : > { %534 = vset.pattern.permute.xlu1 %v244_v45 }
 0x1c1   : > { %246 = vperm.xlu1 %534, %v242_v47  }
 0x228   : > { %v223_v48 = vpop.permute.xlu0 %222 }
 0x229   : > { %vm248_vm4 = vcmp.eq.s32.totalorder %v214_v38, %v223_v48  ;;  %vm249_vm5 = vcmp.eq.s32.totalorder %v215_v40, %v223_v48 }
 0x22a   : > { %435 = vmatprep.mubr.msk.f32.mxu1 %vm249_vm5, %v600_v49 }
 0x22b   : > { %436 = vmatmul.mubr.msk.f32.vlgmr.msra.gmra.mxu1 %vm248_vm4, %v600_v49 }
 0x22c   : > { %v231_v50 = vpop.permute.xlu1 %230 }
 0x22d   : > { %vm250_vm6 = vcmp.eq.s32.totalorder %v214_v38, %v231_v50  ;;  %vm251_vm7 = vcmp.eq.s32.totalorder %v215_v40, %v231_v50 }
 0x22e   : > { %437 = vmatprep.mubr.msk.f32.mxu1 %vm251_vm7, %v600_v49 }
 0x22f   : > { %438 = vmatmul.mubr.msk.f32.gmra.mxu1 %vm250_vm6, %v600_v49 }
 0x234   : > { %v239_v51 = vpop.permute.xlu1 %238 }
 0x235   : > { %vm252_vm8 = vcmp.eq.s32.totalorder %v214_v38, %v239_v51  ;;  %vm253_vm9 = vcmp.eq.s32.totalorder %v215_v40, %v239_v51 }
 0x236   : > { %439 = vmatprep.mubr.msk.f32.mxu1 %vm253_vm9, %v600_v49 }
 0x237   : > { %440 = vmatmul.mubr.msk.f32.gmra.mxu1 %vm252_vm8, %v600_v49 }
 0x23c   : > { %v247_v52 = vpop.permute.xlu1 %246 }
 0x23d   : > { %vm254_vm10 = vcmp.eq.s32.totalorder %v214_v38, %v247_v52  ;;  %vm255_vm11 = vcmp.eq.s32.totalorder %v215_v40, %v247_v52 }
 0x23e   : > { %441 = vmatprep.mubr.msk.f32.mxu1 %vm255_vm11, %v600_v49 }
 0x23f   : > { %442 = vmatmul.mubr.msk.f32.gmra.mxu1 %vm254_vm10, %v600_v49 }
 0x2eb   : > { %v495_v53 = vpop.f32.mrf.mxu1 }
 0x2ed   : > { %v496_v54 = vpop.f32.mrf.mxu1 }
 0x2ee   : > { %v497_v55 = vadd.f32 %v496_v54, %v495_v53 }
 0x2ef   : > { %v498_v56 = vpop.f32.mrf.mxu1 }
 0x2f0   : > { %v382_v57 = vadd.f32 %v497_v55, %v643_v3  ;;  %v357_v11 = vsub.f32 %v497_v55, %v648_v5 }
 0x2f1   : > { %v499_v62 = vpop.f32.mrf.mxu1 }
 0x2f2   : > { %386 = vst [vmem:[#allocation5] sm:$0xff] %v382_v57  ;;  %v500_v63 = vadd.f32 %v499_v62, %v498_v56  ;;  %v365_v15 = vmul.f32 %v357_v11, %v357_v11 }
 0x2f4   : > { %v383_v0 = vadd.f32 %v500_v63, %v645_v4  ;;  %v358_v8 = vsub.f32 %v500_v63, %v652_v6 }
 0x2f6   : > { %387 = vst [vmem:[#allocation5 + $0x8] sm:$0xff] %v383_v0  ;;  %v366_v3 = vmul.f32 %v358_v8, %v358_v8 }
 0x2f7   : > { %v501_v1 = vpop.f32.mrf.mxu1 }
 0x2f8   : > { %v369_v4 = vadd.f32 %v366_v3, %v365_v15 }
 0x2f9   : > { %v502_v2 = vpop.f32.mrf.mxu1 }
 0x2fa   : > { %v503_v7 = vadd.f32 %v502_v2, %v501_v1 }
 0x2fc   : > { %v384_v9 = vadd.f32 %v503_v7, %v696_v58  ;;  %v359_v12 = vsub.f32 %v503_v7, %v701_v60 }
 0x2fe   : > { %388 = vst [vmem:[#allocation5 + $0x10] sm:$0xff] %v384_v9  ;;  %v367_v10 = vmul.f32 %v359_v12, %v359_v12 }
 0x2ff   : > { %v504_v13 = vpop.f32.mrf.mxu1 }
 0x300   : > { %v370_v58 = vadd.f32 %v369_v4, %v367_v10 }
 0x301   : > { %v505_v14 = vpop.f32.mrf.mxu1 }
 0x302   : > { %v506_v16 = vadd.f32 %v505_v14, %v504_v13 }
 0x304   : > { %v360_v17 = vsub.f32 %v506_v16, %v704_v61  ;;  %v385_v18 = vadd.f32 %v506_v16, %v698_v59 }
 0x306   : > { %v368_v6 = vmul.f32 %v360_v17, %v360_v17  ;;  %389 = vst [vmem:[#allocation5 + $0x18] sm:$0xff] %v385_v18 }
 0x308   : > { %v371_v19 = vadd.f32 %v370_v58, %v368_v6 }
 0x30a   : > { %372 = vadd.xlane.f32.xlu1 %v371_v19 }
 0x393   : > { %v373_v5 = vpop.xlane.xlu1 %372 }
 0x394   : > { %v374_v60 = vrot.slane %v373_v5, 4 }
 0x396   : > { %v375_v20 = vadd.f32 %v374_v60, %v373_v5 }
 0x398   : > { %v376_v21 = vrot.slane %v375_v20, 2 }
 0x39a   : > { %v377_v22 = vadd.f32 %v376_v21, %v375_v20 }
 0x39c   : > { %v378_v23 = vrot.slane %v377_v22, 1 }
 0x39e   : > { %v379_v24 = vadd.f32 %v378_v23, %v377_v22 }
 0x3a0   : > { %507 = vpush %v379_v24 }
 0x3d0   :  { %63 = sbr.rel (!%p61_p5) target bundleno = 17 (0x11), region = 53 }
 0x3d1   : > { %s508_s5 = spop %507 }
 0x3d2   : > { %s381_s6 = sadd.f32 %s590_s22, %s508_s5  }
 0x3d4   : > { %s749_s22 = smov %s381_s6  ;;  %v390_v59 = vstv (%p61_p5), %s381_s6 }
 0x3d5   :  { %391 = vst [vmem:[%s748_s4] sm:$0xff] %v390_v59 }
 0x3d6   :  { %567 = shalt.err (!%p564_p10)
}
 0x3d7   :  { %403 = dma.vmem_to_hbm [thread:$0]  %s398_s10, 512, %s747_s3, [#allocation4], %s597_s18, %s597_s18, %s598_s19  }
 0x3d8   :  { %586 = dma.done.wait [#allocation4], 512  }
 0x3d9   :  { %587 = vsyncadd [#allocation4], 4294966784 }
 0x3da   :  { %411 = vsyncpa [#allocation3], 1 }
 0x3db   :  { %412 = vsyncpa [#allocation4], 1 }

</bundles_post_ra>
